<compile_context>
chip_gen: v6e
topology: v6e:2x2x1
jax: 0.10.0
libtpu: 0.0.40
codegen_flags: <defaults>
</compile_context>

<pallas_src>
import jax
import jax.numpy as jnp
from jax.experimental import pallas as pl
from jax.experimental.pallas import tpu as pltpu

TM_TARGET = 8192       # sized to hide ~0.35us/step at v7x HBM BW (~1.1 MB/step needed)
MIN_SPLIT_TM = 512     # don't shrink tiles below this when splitting for megacore
MEGACORE_TILES = 8     # >= 4 tiles per TensorCore on v7x (2 TCs/chip)


def mlp_kernel(x_ref, w1_ref, b1_ref, w2_ref, b2_ref, wp_ref, bp_ref, o_ref):
    # Stream f32 x from HBM, cast to bf16 in-kernel for the MXU; accumulate in
    # f32; bias-add + ReLU stay in f32 on the VPU (v5e has no bf16 VPU path).
    x = x_ref[...].astype(jnp.bfloat16)                                # (TM, F)

    h1 = jnp.dot(x, w1_ref[...], preferred_element_type=jnp.float32)  # f32 acc
    h1 = jnp.maximum(h1 + b1_ref[...], 0.0)

    h2 = jnp.dot(h1.astype(jnp.bfloat16), w2_ref[...],
                 preferred_element_type=jnp.float32)
    h2 = jnp.maximum(h2 + b2_ref[...], 0.0)

    out = jnp.dot(h2.astype(jnp.bfloat16), wp_ref[...],
                  preferred_element_type=jnp.float32) + bp_ref[...]
    o_ref[...] = out.astype(o_ref.dtype)


def _round_up(x, m):
    return (x + m - 1) // m * m


def _pick_tm(B):
    """Batch tile: as large as possible (hide per-step overhead), but keep
    >= MEGACORE_TILES tiles for v7x's two TensorCores once B is large enough
    that splitting still leaves >= MIN_SPLIT_TM-row tiles."""
    tm = min(TM_TARGET, _round_up(B, 8))
    split = _round_up(pl.cdiv(B, MEGACORE_TILES), 8)
    if split >= MIN_SPLIT_TM:
        tm = min(tm, split)
    return max(tm, 8)


def prepare_params(torch_params):
    """One-time glue (NOT per forward call): transpose PyTorch (out,in) weights to
    (in,out), cast weights to bf16 for the MXU, reshape biases to (1,out) f32."""
    def prep_layer(w, b):
        return w.T.astype(jnp.bfloat16), b.reshape(1, -1).astype(jnp.float32)

    w1, b1 = prep_layer(*torch_params["hidden1"])
    w2, b2 = prep_layer(*torch_params["hidden2"])
    wp, bp = prep_layer(*torch_params["predict"])
    # Module is only shape-consistent when n_features == n_hidden.
    assert w1.shape[1] == w2.shape[0], "TestMLP requires n_features == n_hidden"
    assert w2.shape[1] == wp.shape[0], "predict layer input must be n_hidden"
    return (w1, b1, w2, b2, wp, bp)


@jax.jit
def test_mlp_forward(x, prep):
    """x: (B, n_features) float32. prep: output of prepare_params."""
    w1, b1, w2, b2, wp, bp = prep
    B, F = x.shape
    H = w1.shape[1]
    NO = wp.shape[1]

    TM = _pick_tm(B)
    grid = (pl.cdiv(B, TM),)   # ragged last tile handled by Pallas partial blocks

    # VMEM budget: double-buffered streamed blocks + resident weights + in-kernel
    # f32 intermediates (h1, h2) and bf16 casts, plus headroom; clamped well under
    # v7x's 64 MiB physical VMEM.
    streamed = TM * F * 4 + TM * NO * 4                           # x block + out block (f32)
    resident = (F * H + H * H + H * NO) * 2 + (2 * H + NO) * 4    # bf16 weights + f32 biases
    interm = TM * (2 * H * 4 + (F + H) * 2)                       # h1/h2 f32 + bf16 casts
    vmem_bytes = 2 * streamed + 2 * resident + interm + (8 << 20)
    vmem_bytes = min(max(int(vmem_bytes), 16 << 20), 48 << 20)

    cost = pl.CostEstimate(
        flops=2 * B * (F * H + H * H + H * NO),
        transcendentals=0,
        bytes_accessed=B * (F + NO) * 4 + (F * H + H * H + H * NO) * 2 + (2 * H + NO) * 4,
    )

    return pl.pallas_call(
        mlp_kernel,
        out_shape=jax.ShapeDtypeStruct((B, NO), jnp.float32),
        grid=grid,
        in_specs=[
            pl.BlockSpec((TM, F), lambda i: (i, 0)),        # x: streamed f32 per batch tile
            pl.BlockSpec((F, H), lambda i: (0, 0)),         # w1: VMEM-resident
            pl.BlockSpec((1, H), lambda i: (0, 0)),         # b1
            pl.BlockSpec((F, H), lambda i: (0, 0)),         # w2
            pl.BlockSpec((1, H), lambda i: (0, 0)),         # b2
            pl.BlockSpec((H, NO), lambda i: (0, 0)),        # wp
            pl.BlockSpec((1, NO), lambda i: (0, 0)),        # bp
        ],
        out_specs=pl.BlockSpec((TM, NO), lambda i: (i, 0)),
        compiler_params=pltpu.CompilerParams(
            dimension_semantics=("parallel",),              # shard batch tiles across TCs (v7x)
            vmem_limit_bytes=vmem_bytes,
        ),
        cost_estimate=cost,
    )(x, w1, b1, w2, b2, wp, bp)


def init_linear(key, in_features, out_features):
    """Deterministic PyTorch-style Linear init: U(-1/sqrt(in), 1/sqrt(in))."""
    kw, kb = jax.random.split(key)
    bound = 1.0 / jnp.sqrt(jnp.float32(in_features))
    w = jax.random.uniform(kw, (out_features, in_features), jnp.float32, -bound, bound)
    b = jax.random.uniform(kb, (out_features,), jnp.float32, -bound, bound)
    return w, b


def reference_forward(x, torch_params):
    """Pure-JAX f32 reference of the PyTorch forward."""
    w1, b1 = torch_params["hidden1"]
    w2, b2 = torch_params["hidden2"]
    wp, bp = torch_params["predict"]
    h = jnp.maximum(x @ w1.T + b1, 0.0)
    h = jnp.maximum(h @ w2.T + b2, 0.0)
    return h @ wp.T + bp


if __name__ == "__main__":
    n_features, n_hidden, n_output = 32, 32, 8
    batch = 2

    root = jax.random.PRNGKey(0)
    k_x, k1, k2, k3 = jax.random.split(root, 4)

    x = jax.random.normal(k_x, (batch, n_features), jnp.float32)
    torch_params = {
        "hidden1": init_linear(k1, n_features, n_hidden),
        "hidden2": init_linear(k2, n_features, n_hidden),
        "predict": init_linear(k3, n_hidden, n_output),
    }
    prep = prepare_params(torch_params)

    out = test_mlp_forward(x, prep)
    out = jax.block_until_ready(out)

    ref = reference_forward(x, torch_params)
    assert out.shape == (batch, n_output)
    # bf16 matmul inputs with f32 accumulation -> loose tolerance vs. pure-f32 reference.
    assert jnp.allclose(out, ref, atol=5e-2, rtol=5e-2), "mismatch vs. pure-JAX reference"

    print("KERNEL_OK")
</pallas_src>

<mosaic_0001>
module attributes {stable_mosaic.version = 11 : i64} {
  func.func @mlp_kernel(%arg0: i32, %arg1: memref<8x32xf32, #tpu.memory_space<vmem>>, %arg2: memref<32x32xbf16, #tpu.memory_space<vmem>>, %arg3: memref<1x32xf32, #tpu.memory_space<vmem>>, %arg4: memref<32x32xbf16, #tpu.memory_space<vmem>>, %arg5: memref<1x32xf32, #tpu.memory_space<vmem>>, %arg6: memref<32x8xbf16, #tpu.memory_space<vmem>>, %arg7: memref<1x8xf32, #tpu.memory_space<vmem>>, %arg8: memref<8x8xf32, #tpu.memory_space<vmem>>) attributes {dimension_semantics = [#tpu.dimension_semantics<parallel>], iteration_bounds = array<i64: 1>, scalar_prefetch = 0 : i64, scratch_operands = 0 : i64, tpu.core_type = #tpu.core_type<tc>, window_params = [{transform_indices = @transform_0, window_bounds = array<i64: 8, 32>}, {pipeline_mode = #tpu.pipeline_mode<synchronous>, transform_indices = @transform_1, window_bounds = array<i64: 32, 32>}, {pipeline_mode = #tpu.pipeline_mode<synchronous>, transform_indices = @transform_2, window_bounds = array<i64: 1, 32>}, {pipeline_mode = #tpu.pipeline_mode<synchronous>, transform_indices = @transform_3, window_bounds = array<i64: 32, 32>}, {pipeline_mode = #tpu.pipeline_mode<synchronous>, transform_indices = @transform_4, window_bounds = array<i64: 1, 32>}, {pipeline_mode = #tpu.pipeline_mode<synchronous>, transform_indices = @transform_5, window_bounds = array<i64: 32, 8>}, {pipeline_mode = #tpu.pipeline_mode<synchronous>, transform_indices = @transform_6, window_bounds = array<i64: 1, 8>}, {transform_indices = @transform_7, window_bounds = array<i64: 8, 8>}]} {
    %c0 = arith.constant 0 : index
    %c0_0 = arith.constant 0 : index
    %0 = vector.load %arg1[%c0, %c0_0] : memref<8x32xf32, #tpu.memory_space<vmem>>, vector<8x32xf32>
    %1 = arith.truncf %0 : vector<8x32xf32> to vector<8x32xbf16>
    %c0_1 = arith.constant 0 : index
    %c0_2 = arith.constant 0 : index
    %2 = vector.load %arg2[%c0_1, %c0_2] : memref<32x32xbf16, #tpu.memory_space<vmem>>, vector<32x32xbf16>
    %cst = arith.constant dense<0.000000e+00> : vector<8x32xf32>
    %3 = tpu.matmul %1, %2, %cst {dimension_numbers = #tpu.dot_dimension_numbers<[1], [0], [0], [1], [0, 0, 1, 1], [], []>} : vector<8x32xbf16>, vector<32x32xbf16>, vector<8x32xf32> -> vector<8x32xf32>
    %c0_3 = arith.constant 0 : index
    %c0_4 = arith.constant 0 : index
    %4 = vector.load %arg3[%c0_3, %c0_4] : memref<1x32xf32, #tpu.memory_space<vmem>>, vector<1x32xf32>
    %5 = vector.broadcast %4 : vector<1x32xf32> to vector<8x32xf32>
    %6 = arith.addf %3, %5 : vector<8x32xf32>
    %cst_5 = arith.constant 0.000000e+00 : f32
    %7 = vector.broadcast %cst_5 : f32 to vector<8x32xf32>
    %8 = arith.maximumf %6, %7 : vector<8x32xf32>
    %9 = arith.truncf %8 : vector<8x32xf32> to vector<8x32xbf16>
    %c0_6 = arith.constant 0 : index
    %c0_7 = arith.constant 0 : index
    %10 = vector.load %arg4[%c0_6, %c0_7] : memref<32x32xbf16, #tpu.memory_space<vmem>>, vector<32x32xbf16>
    %cst_8 = arith.constant dense<0.000000e+00> : vector<8x32xf32>
    %11 = tpu.matmul %9, %10, %cst_8 {dimension_numbers = #tpu.dot_dimension_numbers<[1], [0], [0], [1], [0, 0, 1, 1], [], []>} : vector<8x32xbf16>, vector<32x32xbf16>, vector<8x32xf32> -> vector<8x32xf32>
    %c0_9 = arith.constant 0 : index
    %c0_10 = arith.constant 0 : index
    %12 = vector.load %arg5[%c0_9, %c0_10] : memref<1x32xf32, #tpu.memory_space<vmem>>, vector<1x32xf32>
    %13 = vector.broadcast %12 : vector<1x32xf32> to vector<8x32xf32>
    %14 = arith.addf %11, %13 : vector<8x32xf32>
    %cst_11 = arith.constant 0.000000e+00 : f32
    %15 = vector.broadcast %cst_11 : f32 to vector<8x32xf32>
    %16 = arith.maximumf %14, %15 : vector<8x32xf32>
    %17 = arith.truncf %16 : vector<8x32xf32> to vector<8x32xbf16>
    %c0_12 = arith.constant 0 : index
    %c0_13 = arith.constant 0 : index
    %18 = vector.load %arg6[%c0_12, %c0_13] : memref<32x8xbf16, #tpu.memory_space<vmem>>, vector<32x8xbf16>
    %cst_14 = arith.constant dense<0.000000e+00> : vector<8x8xf32>
    %19 = tpu.matmul %17, %18, %cst_14 {dimension_numbers = #tpu.dot_dimension_numbers<[1], [0], [0], [1], [0, 0, 1, 1], [], []>} : vector<8x32xbf16>, vector<32x8xbf16>, vector<8x8xf32> -> vector<8x8xf32>
    %c0_15 = arith.constant 0 : index
    %c0_16 = arith.constant 0 : index
    %20 = vector.load %arg7[%c0_15, %c0_16] : memref<1x8xf32, #tpu.memory_space<vmem>>, vector<1x8xf32>
    %21 = vector.broadcast %20 : vector<1x8xf32> to vector<8x8xf32>
    %22 = arith.addf %19, %21 : vector<8x8xf32>
    %c0_17 = arith.constant 0 : index
    %c0_18 = arith.constant 0 : index
    %23 = vector.load %arg8[%c0_17, %c0_18] : memref<8x8xf32, #tpu.memory_space<vmem>>, vector<8x8xf32>
    tpu.vector_store %arg8[%c0_17, %c0_18], %22 {strides = array<i32>} : memref<8x8xf32, #tpu.memory_space<vmem>>, vector<8x8xf32>,
    return
  }
  func.func @transform_0(%arg0: i32) -> (i32, i32) {
    %c0_i32 = arith.constant 0 : i32
    %c0_i32_0 = arith.constant 0 : i32
    return %arg0, %c0_i32 : i32, i32
  }
  func.func @transform_1(%arg0: i32) -> (i32, i32) {
    %c0_i32 = arith.constant 0 : i32
    %c0_i32_0 = arith.constant 0 : i32
    %c0_i32_1 = arith.constant 0 : i32
    return %c0_i32, %c0_i32_0 : i32, i32
  }
  func.func @transform_2(%arg0: i32) -> (i32, i32) {
    %c0_i32 = arith.constant 0 : i32
    %c0_i32_0 = arith.constant 0 : i32
    %c0_i32_1 = arith.constant 0 : i32
    return %c0_i32, %c0_i32_0 : i32, i32
  }
  func.func @transform_3(%arg0: i32) -> (i32, i32) {
    %c0_i32 = arith.constant 0 : i32
    %c0_i32_0 = arith.constant 0 : i32
    %c0_i32_1 = arith.constant 0 : i32
    return %c0_i32, %c0_i32_0 : i32, i32
  }
  func.func @transform_4(%arg0: i32) -> (i32, i32) {
    %c0_i32 = arith.constant 0 : i32
    %c0_i32_0 = arith.constant 0 : i32
    %c0_i32_1 = arith.constant 0 : i32
    return %c0_i32, %c0_i32_0 : i32, i32
  }
  func.func @transform_5(%arg0: i32) -> (i32, i32) {
    %c0_i32 = arith.constant 0 : i32
    %c0_i32_0 = arith.constant 0 : i32
    %c0_i32_1 = arith.constant 0 : i32
    return %c0_i32, %c0_i32_0 : i32, i32
  }
  func.func @transform_6(%arg0: i32) -> (i32, i32) {
    %c0_i32 = arith.constant 0 : i32
    %c0_i32_0 = arith.constant 0 : i32
    %c0_i32_1 = arith.constant 0 : i32
    return %c0_i32, %c0_i32_0 : i32, i32
  }
  func.func @transform_7(%arg0: i32) -> (i32, i32) {
    %c0_i32 = arith.constant 0 : i32
    %c0_i32_0 = arith.constant 0 : i32
    return %arg0, %c0_i32 : i32, i32
  }
}

</mosaic_0001>

<bundles_post_ra>
// kernel: test_mlp_forward.1
= control target key start
LH: loop header
LB: loop body
LE: loop exit
PB: predicated region body
PF: predicated region fallthrough
CT: control target
= control target key end

     0   :  { %12 = vsyncpa [#allocation3], 0  ;;  %s450_s0 = inlined_call_operand.vmem [shape: f32[2,32], index: 0, kind: input, shape index: {}]   ;;  %s451_s1 = inlined_call_operand.vmem [shape: bf16[32,32], index: 1, kind: input, shape index: {}]   ;;  %s452_s2 = inlined_call_operand.vmem [shape: f32[1,32], index: 2, kind: input, shape index: {}]   ;;  %s453_s3 = inlined_call_operand.hbm [shape: bf16[32,32], index: 3, kind: input, shape index: {}]   ;;  %s454_s4 = inlined_call_operand.vmem [shape: f32[1,32], index: 4, kind: input, shape index: {}]   ;;  %s455_s5 = inlined_call_operand.vmem [shape: bf16[32,8], index: 5, kind: input, shape index: {}]   ;;  %s456_s6 = inlined_call_operand.vmem [shape: f32[1,8], index: 6, kind: input, shape index: {}]   ;;  %s457_s7 = inlined_call_operand.hbm [shape: f32[2,8], index: 7, kind: output, shape index: {}]  }
   0x1   :  { %13 = vsyncpa [#allocation4], 0  ;;  %s369_s24 = smov [#allocation2]  }
   0x2   :  { %s25_s25 = sshll.u32 %s369_s24, 4  ;;  %s26_s25 = int_to_ptr.vmem [resolvable:$true] %s25_s25 }
   0x3   :  { %s333_s26 = scalar_lea.vmem %s26_s25, 256  ;;  %p338_p1 = scmp.lt.s32.totalorder %s26_s25, %s26_s25 }
   0x4   :  { %p334_p0 = scmp.ne.s32.totalorder %s26_s25, %s333_s26  ;;  %p339_p2 = scmp.lt.s32.totalorder %s333_s26, %s333_s26 }
   0x6   :  { %p340_p3 = por %p339_p2, %p338_p1 }
   0x8   :  { %p341_p4 = pnand %p340_p3, %p334_p0 }
   0xa   :  { %344 = shalt.err (!%p341_p4)
}
   0xb   :  { %s370_s27 = smov 64   ;;  %s371_s28 = smov 4  }
   0xc   :  { %31 = dma.hbm_to_vmem [thread:$0]  %s453_s3, 256, %s26_s25, [#allocation3], %s370_s27, %s370_s27, %s371_s28  }
   0xd   :  { %365 = dma.done.wait [#allocation3], 256  }
   0xe   :  { %366 = vsyncadd [#allocation3], 4294967040  ;;  %v372_v0 = vmov 0.0   ;;  %vm373_vm0 = vmmov 0   ;;  %v319_v1 = vld [vmem:[%s451_s1 + $0x8] sm:$0xff]   ;;  %v320_v2 = vld [vmem:[%s451_s1] sm:$0xff]  }
   0xf   :  { %287 = vmatprep.subr.bf16.mxu0 %v372_v0  ;;  %291 = vmatprep.mubr.msk.bf16.mxu0 %vm373_vm0, %v372_v0  ;;  %v42_v3 = vld [vmem:[%s450_s0] sm:$0xff]  ;;  %vm67_vm1 = vcmask 261120   ;;  %v321_v5 = vld [vmem:[#allocation2 + $0x8] sm:$0xff]   ;;  %vm247_vm2 = vcmask 64512  }
  0x10   :  { %295 = vmatprep.subr.bf16.mxu1 %v372_v0  ;;  %299 = vmatprep.mubr.msk.bf16.mxu1 %vm373_vm0, %v372_v0  ;;  %v43_v4 = vpack.c.bf16 %v42_v3, %v42_v3  ;;  %v322_v6 = vld [vmem:[#allocation2] sm:$0xff]   ;;  %v323_v7 = vld [vmem:[%s455_s5 + $0x8] sm:$0xff]  }
  0x11   :  { %288 = vmatpush3.bf16.msra.mxu0 %v319_v1  ;;  %296 = vmatpush3.bf16.msra.mxu1 %v321_v5  ;;  %v266_v8 = vld [vmem:[%s452_s2] ss:$0 sm:$0xff] }
  0x12   :  { %289 = vmatprep.subr.bf16.mxu0 %v372_v0  ;;  %297 = vmatprep.subr.bf16.mxu1 %v372_v0  ;;  %v324_v16 = vld [vmem:[%s455_s5] sm:$0xff]  }
  0x13   :  { %v270_v17 = vld [vmem:[%s454_s4] ss:$0 sm:$0xff] }
  0x14   :  { %v274_v25 = vld [vmem:[%s456_s6] ss:$0 sm:$0xff] }
  0x15   :  { %290 = vmatpush3.bf16.msra.mxu0 %v320_v2  ;;  %298 = vmatpush3.bf16.msra.mxu1 %v322_v6 }
  0x16   :  { %303 = vmatprep.subr.bf16.mxu0 %v372_v0 }
  0x18   :  { %292 = vmatmul.mubr.msk.bf16.vlgmr.msra.gmra.mxu0 %vm67_vm1, %v43_v4 }
  0x19   :  { %307 = vmatprep.mubr.msk.bf16.mxu0 %vm373_vm0, %v372_v0  ;;  %304 = vmatpush3.bf16.msra.mxu0 %v323_v7 }
  0x1a   :  { %305 = vmatprep.subr.bf16.mxu0 %v372_v0 }
  0x1d   :  { %306 = vmatpush3.bf16.msra.mxu0 %v324_v16 }
  0xd8   :  { %v105_v9 = vpop.f32.mrf.mxu0 }
  0xd9   :  { %v106_v10 = vadd.f32 %v266_v8, %v105_v9 }
  0xda   :  { %v293_v11 = vpop.f32.mrf.mxu0 }
  0xdb   :  { %v111_v12 = vmax.f32 %v106_v10, 0.0 }
  0xdc   :  { %v108_v13 = vpop.f32.mrf.mxu0 }
  0xdd   :  { %v112_v14 = vpack.c.bf16 %v111_v12, %v111_v12 }
  0xde   :  { %v294_v15 = vpop.f32.mrf.mxu0 }
  0xdf   :  { %300 = vmatmul.mubr.msk.bf16.vlgmr.msra.gmra.mxu1 %vm67_vm1, %v112_v14 }
 0x19f   :  { %v173_v18 = vpop.f32.mrf.mxu1 }
 0x1a0   :  { %v174_v19 = vadd.f32 %v270_v17, %v173_v18 }
 0x1a1   :  { %v301_v20 = vpop.f32.mrf.mxu1 }
 0x1a2   :  { %v179_v21 = vmax.f32 %v174_v19, 0.0 }
 0x1a3   :  { %v176_v22 = vpop.f32.mrf.mxu1 }
 0x1a4   :  { %v180_v23 = vpack.c.bf16 %v179_v21, %v179_v21 }
 0x1a5   :  { %v302_v24 = vpop.f32.mrf.mxu1 }
 0x1a6   :  { %308 = vmatmul.mubr.msk.bf16.vlgmr.msra.gmra.mxu0 %vm67_vm1, %v180_v23 }
 0x266   :  { %v241_v26 = vpop.f32.mrf.mxu0 }
 0x267   :  { %v242_v27 = vadd.f32 %v274_v25, %v241_v26 }
 0x268   :  { %v309_v28 = vpop.f32.mrf.mxu0 }
 0x269   :  { %248 = vst.msk [vmem:[#allocation5] sm:$0xff] %vm247_vm2, %v242_v27 }
 0x26a   :  { %v244_v29 = vpop.f32.mrf.mxu0 }
 0x26c   :  { %v310_v30 = vpop.f32.mrf.mxu0 }
 0x26d   :  { %253 = vsyncadd [#allocation4], 96  ;;  %s374_s4 = smov [#allocation5]  }
 0x26e   :  { %s254_s5 = sshll.u32 %s374_s4, 4  ;;  %s255_s5 = int_to_ptr.vmem [resolvable:$true] %s254_s5 }
 0x26f   :  { %s345_s20 = scalar_lea.vmem %s255_s5, 32  ;;  %s349_s21 = scalar_lea.vmem %s255_s5, 128 }
 0x270   :  { %p346_p5 = scmp.ne.s32.totalorder %s255_s5, %s345_s20  ;;  %p350_p6 = scmp.lt.s32.totalorder %s255_s5, %s255_s5 }
 0x271   :  { %p351_p7 = scmp.lt.s32.totalorder %s349_s21, %s345_s20 }
 0x273   :  { %p352_p8 = por %p351_p7, %p350_p6 }
 0x275   :  { %p353_p9 = pnand %p352_p8, %p346_p5 }
 0x277   :  { %356 = shalt.err (!%p353_p9)
}
 0x278   :  { %s375_s6 = smov 32   ;;  %s376_s22 = smov 2  }
 0x279   :  { %260 = dma.vmem_to_hbm [thread:$0]  %s255_s5, 32, %s457_s7, [#allocation4], %s375_s6, %s375_s6, %s376_s22  }
 0x27a   :  { %367 = dma.done.wait [#allocation4], 128  }
 0x27b   :  { %368 = vsyncadd [#allocation4], 4294967168 }
 0x27c   :  { %264 = vsyncpa [#allocation3], 1 }
 0x27d   :  { %265 = vsyncpa [#allocation4], 1 }

</bundles_post_ra>
